<compile_context>
chip_gen: v5e
topology: v5e:2x2
jax: 0.10.0
libtpu: 0.0.40
codegen_flags: <defaults>
</compile_context>

<pallas_src>
import functools
import math

import jax
import jax.numpy as jnp
from jax.experimental import pallas as pl
from jax.experimental.pallas import tpu as pltpu

# ----------------------------- tiny synthetic config -----------------------------
# vision (CLIP-like)
V_IMAGE_SIZE = 16
V_PATCH = 8
VH = 32                      # vision hidden size
V_HEADS = 4
V_HEAD_DIM = VH // V_HEADS
V_INTER = 64
V_LAYERS = 2
V_NUM_POS = (V_IMAGE_SIZE // V_PATCH) ** 2 + 1   # 5 (CLS + 4 patches)
VISION_FEATURE_LAYER = -2
VISION_FEATURE_SELECT = "default"                # drop CLS

# text (Llama-like)
TH = 32                      # text hidden size
T_HEADS = 4
T_HEAD_DIM = TH // T_HEADS
T_INTER = 64
T_LAYERS = 2
VOCAB = 128
RMS_EPS = 1e-5
ROPE_THETA = 10000.0

IMAGE_TOKEN_ID = 100
IMAGE_GRID_PINPOINTS = [[16, 16], [16, 32], [32, 16], [32, 32]]

LN_EPS = 1e-5

BF16 = jnp.bfloat16
F32 = jnp.float32

# safe scoped-VMEM raise on v5e/v6e (128 MiB) and v7x (64 MiB)
VMEM_LIMIT_BYTES = 48 * 1024 * 1024


def _act(y, act):
    if act == "quick_gelu":          # CLIP MLP activation
        return y * jax.nn.sigmoid(1.702 * y)
    if act == "gelu":                # projector activation (exact erf gelu)
        return jax.nn.gelu(y, approximate=False)
    return y


def _pick_tile(dim, prefs):
    # TODO(synk): non-dividing dims fall back to a full-extent block; real non-128-multiple
    # vocab/hidden sizes should be padded + masked instead.
    for t in prefs:
        if t <= dim and dim % t == 0:
            return t
    return dim


# ----------------------------- generic tiled fused matmul -----------------------------
# prologue:  optional LayerNorm / RMSNorm of the x tile (requires full-K x tile)
# epilogue:  optional bias add, activation, residual add (all on the f32 accumulator)
def _fused_matmul_kernel(*refs, norm, has_bias, has_res, act, eps):
    it = iter(refs)
    x_ref = next(it)
    g_ref = next(it) if norm is not None else None
    nb_ref = next(it) if norm == "layer" else None
    w_ref = next(it)
    bias_ref = next(it) if has_bias else None
    res_ref = next(it) if has_res else None
    o_ref = next(it)
    acc_ref = next(it)

    @pl.when(pl.program_id(2) == 0)
    def _():
        acc_ref[...] = jnp.zeros_like(acc_ref)

    x = x_ref[...]
    if norm == "layer":
        xf = x.astype(jnp.float32)
        mu = jnp.mean(xf, axis=-1, keepdims=True)
        var = jnp.mean(jnp.square(xf - mu), axis=-1, keepdims=True)
        h = ((xf - mu) * jax.lax.rsqrt(var + eps) * g_ref[...] + nb_ref[...]
             ).astype(w_ref.dtype)
    elif norm == "rms":
        xf = x.astype(jnp.float32)
        var = jnp.mean(xf * xf, axis=-1, keepdims=True)
        h = (xf * jax.lax.rsqrt(var + eps) * g_ref[...]).astype(w_ref.dtype)
    else:
        h = x
    acc_ref[...] += jnp.dot(h, w_ref[...], preferred_element_type=jnp.float32)

    @pl.when(pl.program_id(2) == pl.num_programs(2) - 1)
    def _():
        y = acc_ref[...]
        if has_bias:
            y = y + bias_ref[...].astype(jnp.float32)
        y = _act(y, act)
        if has_res:
            y = y + res_ref[...].astype(jnp.float32)
        o_ref[...] = y.astype(o_ref.dtype)


def fused_matmul(x, w, *, bias=None, act="none", residual=None,
                 norm=None, gamma=None, beta=None, eps=LN_EPS, out_dtype=BF16):
    """bf16 (M,K)@(K,N), tiled (M,N,K) grid, f32 accumulator, fused norm/bias/act/residual."""
    M, K = x.shape
    N = w.shape[1]
    tm = _pick_tile(M, (512, 256, 128))
    tn = _pick_tile(N, (512, 256, 128))
    # norm prologue needs the whole row -> full-K x tile (fine at hidden-sized K)
    tk = K if norm is not None else _pick_tile(K, (2048, 1024, 512, 256))
    grid = (M // tm, N // tn, K // tk)

    in_specs = [pl.BlockSpec((tm, tk), lambda i, j, k: (i, k))]
    args = [x]
    if norm is not None:
        in_specs.append(pl.BlockSpec((1, tk), lambda i, j, k: (0, k)))
        args.append(gamma)
        if norm == "layer":
            in_specs.append(pl.BlockSpec((1, tk), lambda i, j, k: (0, k)))
            args.append(beta)
    in_specs.append(pl.BlockSpec((tk, tn), lambda i, j, k: (k, j)))
    args.append(w)
    if bias is not None:
        in_specs.append(pl.BlockSpec((1, tn), lambda i, j, k: (0, j)))
        args.append(bias)
    if residual is not None:
        in_specs.append(pl.BlockSpec((tm, tn), lambda i, j, k: (i, j)))
        args.append(residual)

    kern = functools.partial(_fused_matmul_kernel, norm=norm,
                             has_bias=bias is not None,
                             has_res=residual is not None, act=act, eps=eps)
    return pl.pallas_call(
        kern,
        out_shape=jax.ShapeDtypeStruct((M, N), out_dtype),
        grid=grid,
        in_specs=in_specs,
        out_specs=pl.BlockSpec((tm, tn), lambda i, j, k: (i, j)),
        scratch_shapes=[pltpu.VMEM((tm, tn), jnp.float32)],
        compiler_params=pltpu.CompilerParams(
            dimension_semantics=("parallel", "parallel", "arbitrary"),
            vmem_limit_bytes=VMEM_LIMIT_BYTES),
    )(*args)


# ----------------------------- RMSNorm -> gate/up dots -> SiLU gating -----------------------------
def _rms_swiglu_kernel(x_ref, g_ref, wg_ref, wu_ref, o_ref, *, eps):
    x = x_ref[...].astype(jnp.float32)
    var = jnp.mean(x * x, axis=-1, keepdims=True)
    h = (x * jax.lax.rsqrt(var + eps) * g_ref[...]).astype(wg_ref.dtype)
    gate = jnp.dot(h, wg_ref[...], preferred_element_type=jnp.float32)
    up = jnp.dot(h, wu_ref[...], preferred_element_type=jnp.float32)
    o_ref[...] = (gate * jax.nn.sigmoid(gate) * up).astype(o_ref.dtype)


def fused_rms_swiglu(x, gamma, w_gate, w_up, eps=RMS_EPS):
    M, K = x.shape
    N = w_gate.shape[1]
    tm = _pick_tile(M, (512, 256, 128))
    tn = _pick_tile(N, (512, 256, 128))
    return pl.pallas_call(
        functools.partial(_rms_swiglu_kernel, eps=eps),
        out_shape=jax.ShapeDtypeStruct((M, N), BF16),
        grid=(M // tm, N // tn),
        in_specs=[pl.BlockSpec((tm, K), lambda i, j: (i, 0)),
                  pl.BlockSpec((1, K), lambda i, j: (0, 0)),
                  pl.BlockSpec((K, tn), lambda i, j: (0, j)),
                  pl.BlockSpec((K, tn), lambda i, j: (0, j))],
        out_specs=pl.BlockSpec((tm, tn), lambda i, j: (i, j)),
        compiler_params=pltpu.CompilerParams(
            dimension_semantics=("parallel", "parallel"),
            vmem_limit_bytes=VMEM_LIMIT_BYTES),
    )(x, gamma, w_gate, w_up)


# ----------------------------- attention (packed heads, fused RoPE, q-tiled) -----------------------------
def _attn_kernel(*refs, heads, head_dim, scale, causal, use_rope, q_tile):
    if use_rope:
        q_ref, kv_ref, cos_ref, sin_ref, o_ref = refs
    else:
        q_ref, kv_ref, o_ref = refs
    D = heads * head_dim
    half = head_dim // 2
    qi = pl.program_id(1)

    q_blk = q_ref[0]                       # (tq, 3*D) bf16
    kv_blk = kv_ref[0]                     # (S,  3*D) bf16
    tq = q_blk.shape[0]
    S = kv_blk.shape[0]

    if use_rope:
        cos_k = cos_ref[...]               # (S, half) f32
        sin_k = sin_ref[...]
        q_start = pl.multiple_of(qi * q_tile, q_tile)
        cos_q = cos_ref[pl.ds(q_start, q_tile), :]
        sin_q = sin_ref[pl.ds(q_start, q_tile), :]

    if causal:
        row = qi * q_tile + jax.lax.broadcasted_iota(jnp.int32, (tq, S), 0)
        col = jax.lax.broadcasted_iota(jnp.int32, (tq, S), 1)
        causal_bias = jnp.where(col <= row, jnp.float32(0.0), jnp.float32(-1e30))

    outs = []
    for h in range(heads):                 # all heads in one grid step -> lane-dense output
        q_h = q_blk[:, h * head_dim:(h + 1) * head_dim].astype(jnp.float32) * scale
        k_h = kv_blk[:, D + h * head_dim:D + (h + 1) * head_dim].astype(jnp.float32)
        v_h = kv_blk[:, 2 * D + h * head_dim:2 * D + (h + 1) * head_dim]
        if use_rope:
            # rotate-half RoPE expressed as two half-width dots (no in-kernel concat).
            q1, q2 = q_h[:, :half], q_h[:, half:]
            k1, k2 = k_h[:, :half], k_h[:, half:]
            rq1 = q1 * cos_q - q2 * sin_q
            rq2 = q2 * cos_q + q1 * sin_q
            rk1 = k1 * cos_k - k2 * sin_k
            rk2 = k2 * cos_k + k1 * sin_k
            s = (jax.lax.dot_general(rq1.astype(BF16), rk1.astype(BF16),
                                     (((1,), (1,)), ((), ())),
                                     preferred_element_type=jnp.float32)
                 + jax.lax.dot_general(rq2.astype(BF16), rk2.astype(BF16),
                                       (((1,), (1,)), ((), ())),
                                       preferred_element_type=jnp.float32))
        else:
            s = jax.lax.dot_general(q_h.astype(BF16), k_h.astype(BF16),
                                    (((1,), (1,)), ((), ())),
                                    preferred_element_type=jnp.float32)
        if causal:
            s = s + causal_bias
        m = jnp.max(s, axis=-1, keepdims=True)
        p = jnp.exp(s - m)
        l = jnp.sum(p, axis=-1, keepdims=True)
        acc = jnp.dot(p.astype(v_h.dtype), v_h, preferred_element_type=jnp.float32)
        outs.append(acc * pl.reciprocal(l, approx=True))
    o_ref[0] = jnp.concatenate(outs, axis=-1).astype(o_ref.dtype)


def pallas_attention(qkv, *, heads, head_dim, scale, causal,
                     rope_cos=None, rope_sin=None):
    """qkv: (N, S, 3*H*Dh) bf16 (fused projection, no head transposes). Returns (N, S, H*Dh)."""
    N, S, _ = qkv.shape
    D = heads * head_dim
    tq = _pick_tile(S, (256, 128, 64, 32, 16))
    use_rope = rope_cos is not None
    kern = functools.partial(_attn_kernel, heads=heads, head_dim=head_dim,
                             scale=scale, causal=causal, use_rope=use_rope, q_tile=tq)
    # qkv is passed twice: a q-tile row view and a full-S KV view (full 3*D width so the
    # toy D is not forced through a sub-128 lane block; at real sizes column-block by D).
    in_specs = [pl.BlockSpec((1, tq, 3 * D), lambda n, qi: (n, qi, 0)),
                pl.BlockSpec((1, S, 3 * D), lambda n, qi: (n, 0, 0))]
    args = [qkv, qkv]
    if use_rope:
        half = head_dim // 2
        in_specs += [pl.BlockSpec((S, half), lambda n, qi: (0, 0)),
                     pl.BlockSpec((S, half), lambda n, qi: (0, 0))]
        args += [rope_cos, rope_sin]
    return pl.pallas_call(
        kern,
        out_shape=jax.ShapeDtypeStruct((N, S, D), BF16),
        grid=(N, S // tq),
        in_specs=in_specs,
        out_specs=pl.BlockSpec((1, tq, D), lambda n, qi: (n, qi, 0)),
        compiler_params=pltpu.CompilerParams(
            dimension_semantics=("parallel", "parallel")),
    )(*args)


# ----------------------------- standalone norms (residual-stream bases), row-tiled -----------------------------
def _layernorm_kernel(x_ref, g_ref, b_ref, o_ref, *, eps):
    x = x_ref[...].astype(jnp.float32)
    mu = jnp.mean(x, axis=-1, keepdims=True)
    var = jnp.mean(jnp.square(x - mu), axis=-1, keepdims=True)
    o_ref[...] = ((x - mu) * jax.lax.rsqrt(var + eps) * g_ref[...] + b_ref[...]
                  ).astype(o_ref.dtype)


def pallas_layernorm(x, g, b, eps=LN_EPS):
    M, D = x.shape
    tm = _pick_tile(M, (1024, 512, 256, 128))
    return pl.pallas_call(
        functools.partial(_layernorm_kernel, eps=eps),
        out_shape=jax.ShapeDtypeStruct((M, D), BF16),
        grid=(M // tm,),
        in_specs=[pl.BlockSpec((tm, D), lambda i: (i, 0)),
                  pl.BlockSpec((1, D), lambda i: (0, 0)),
                  pl.BlockSpec((1, D), lambda i: (0, 0))],
        out_specs=pl.BlockSpec((tm, D), lambda i: (i, 0)),
        compiler_params=pltpu.CompilerParams(dimension_semantics=("parallel",)),
    )(x, g, b)


def _rmsnorm_kernel(x_ref, w_ref, o_ref, *, eps):
    x = x_ref[...].astype(jnp.float32)
    var = jnp.mean(x * x, axis=-1, keepdims=True)
    o_ref[...] = (x * jax.lax.rsqrt(var + eps) * w_ref[...]).astype(o_ref.dtype)


def pallas_rmsnorm(x, w, eps=RMS_EPS):
    M, D = x.shape
    tm = _pick_tile(M, (1024, 512, 256, 128))
    return pl.pallas_call(
        functools.partial(_rmsnorm_kernel, eps=eps),
        out_shape=jax.ShapeDtypeStruct((M, D), BF16),
        grid=(M // tm,),
        in_specs=[pl.BlockSpec((tm, D), lambda i: (i, 0)),
                  pl.BlockSpec((1, D), lambda i: (0, 0))],
        out_specs=pl.BlockSpec((tm, D), lambda i: (i, 0)),
        compiler_params=pltpu.CompilerParams(dimension_semantics=("parallel",)),
    )(x, w)


# ----------------------------- parameter init -----------------------------
def init_params(key):
    keys = iter(jax.random.split(key, 512))

    def nrm(shape, scale=0.02, dtype=F32):
        return (scale * jax.random.normal(next(keys), shape, dtype=F32)).astype(dtype)

    params = {
        # CLIP vision tower (patch_w stored pre-transposed as (C*P*P, VH) for the matmul)
        "patch_w": nrm((3 * V_PATCH * V_PATCH, VH), dtype=BF16),
        "class_emb": nrm((VH,)),
        "pos_emb": nrm((V_NUM_POS, VH)),
        "pre_ln_g": jnp.ones((1, VH), F32), "pre_ln_b": jnp.zeros((1, VH), F32),
        "v_layers": [],
        # multimodal projector
        "proj1_w": nrm((VH, TH), dtype=BF16), "proj1_b": jnp.zeros((1, TH), BF16),
        "proj2_w": nrm((TH, TH), dtype=BF16), "proj2_b": jnp.zeros((1, TH), BF16),
        "image_newline": nrm((TH,)),
        # language model
        "embed_tokens": nrm((VOCAB, TH), dtype=BF16),
        "t_layers": [],
        "final_norm": jnp.ones((1, TH), F32),
        "lm_head": nrm((TH, VOCAB), dtype=BF16),
    }
    for _ in range(V_LAYERS):
        params["v_layers"].append({
            "ln1_g": jnp.ones((1, VH), F32), "ln1_b": jnp.zeros((1, VH), F32),
            "qkv_w": nrm((VH, 3 * VH), dtype=BF16),          # fused q|k|v
            "qkv_b": jnp.zeros((1, 3 * VH), BF16),
            "o_w": nrm((VH, VH), dtype=BF16), "o_b": jnp.zeros((1, VH), BF16),
            "ln2_g": jnp.ones((1, VH), F32), "ln2_b": jnp.zeros((1, VH), F32),
            "fc1_w": nrm((VH, V_INTER), dtype=BF16), "fc1_b": jnp.zeros((1, V_INTER), BF16),
            "fc2_w": nrm((V_INTER, VH), dtype=BF16), "fc2_b": jnp.zeros((1, VH), BF16),
        })
    for _ in range(T_LAYERS):
        params["t_layers"].append({
            "in_ln": jnp.ones((1, TH), F32),
            "qkv_w": nrm((TH, 3 * TH), dtype=BF16),          # fused q|k|v
            "o_w": nrm((TH, TH), dtype=BF16),
            "post_ln": jnp.ones((1, TH), F32),
            "gate_w": nrm((TH, T_INTER), dtype=BF16),
            "up_w": nrm((TH, T_INTER), dtype=BF16),
            "down_w": nrm((T_INTER, TH), dtype=BF16),
        })
    return params


# ----------------------------- vision tower -----------------------------
def clip_encoder_layer(p, x):
    N, S, D = x.shape
    xf = x.reshape(N * S, D)
    # LN1 fused into fused-QKV projection (single tiled matmul)
    qkv = fused_matmul(xf, p["qkv_w"], bias=p["qkv_b"],
                       norm="layer", gamma=p["ln1_g"], beta=p["ln1_b"], eps=LN_EPS)
    # attention directly on the (N, S, 3*H*Dh) layout — no head transposes
    o = pallas_attention(qkv.reshape(N, S, 3 * D), heads=V_HEADS, head_dim=V_HEAD_DIM,
                         scale=V_HEAD_DIM ** -0.5, causal=False)
    x1 = fused_matmul(o.reshape(N * S, D), p["o_w"], bias=p["o_b"], residual=xf)
    # LN2 fused into fc1 (+quick_gelu); fc2 + residual fused
    h = fused_matmul(x1, p["fc1_w"], bias=p["fc1_b"], act="quick_gelu",
                     norm="layer", gamma=p["ln2_g"], beta=p["ln2_b"], eps=LN_EPS)
    x2 = fused_matmul(h, p["fc2_w"], bias=p["fc2_b"], residual=x1)
    return x2.reshape(N, S, D)


def clip_vision_tower(params, pixel_values, feature_layer=VISION_FEATURE_LAYER):
    # pixel_values: (N, C, H, W), NCHW like PyTorch.
    N, C, H, W = pixel_values.shape
    P = V_PATCH
    gh, gw = H // P, W // P
    L = gh * gw
    # Conv2d(stride=P, kernel=P, no bias) == patchify + matmul; pos-emb add fused as the
    # epilogue "residual" of the tiled matmul kernel.
    patches = pixel_values.reshape(N, C, gh, P, gw, P)
    patches = jnp.transpose(patches, (0, 2, 4, 1, 3, 5)).reshape(N * L, C * P * P)
    pos_tiled = jnp.tile(params["pos_emb"][1:], (N, 1))           # (N*L, VH) f32
    patch_embeds = fused_matmul(patches.astype(BF16), params["patch_w"],
                                residual=pos_tiled).reshape(N, L, VH)

    cls = (params["class_emb"] + params["pos_emb"][0]).astype(BF16)
    cls = jnp.broadcast_to(cls[None, None, :], (N, 1, VH))
    x = jnp.concatenate([cls, patch_embeds], axis=1)              # (N, S, VH)
    S = L + 1
    x = pallas_layernorm(x.reshape(N * S, VH),
                         params["pre_ln_g"], params["pre_ln_b"]).reshape(N, S, VH)

    hidden_states = [x]
    for layer in params["v_layers"]:
        x = clip_encoder_layer(layer, x)
        hidden_states.append(x)
    return hidden_states[feature_layer]


# ----------------------------- anyres patch merging (glue, host-side) -----------------------------
def select_best_resolution(original_size, possible_resolutions):
    orig_w, orig_h = original_size
    best_fit, max_eff, min_wasted = None, 0, math.inf
    for (w, h) in possible_resolutions:
        scale = min(w / orig_w, h / orig_h)
        dw, dh = int(orig_w * scale), int(orig_h * scale)
        eff = min(dw * dh, orig_w * orig_h)
        wasted = w * h - eff
        if eff > max_eff or (eff == max_eff and wasted < min_wasted):
            max_eff, min_wasted, best_fit = eff, wasted, (w, h)
    return best_fit


def get_anyres_image_grid_shape(image_size, grid_pinpoints, patch_size):
    w, h = select_best_resolution(image_size, grid_pinpoints)
    return w // patch_size, h // patch_size


def unpad_image(tensor, original_size):
    # tensor: (hidden, H, W); original_size passed as (width, height) per vLLM call-site.
    oh, ow = original_size
    ch, cw = tensor.shape[1], tensor.shape[2]
    if ow / oh > cw / ch:
        scale = cw / ow
        new_h = int(oh * scale)
        pad = (ch - new_h) // 2
        return tensor[:, pad:ch - pad]
    else:
        scale = ch / oh
        new_w = int(ow * scale)
        pad = (cw - new_w) // 2
        return tensor[:, :, pad:cw - pad]


def merge_image_patch_embeddings(image_size, patch_embeddings, image_newline):
    # strategy = 'spatial_unpad'
    # TODO(synk): uses Python ints over image_sizes so it is eager-only (matches vLLM host logic).
    orig_w, orig_h = int(image_size[0]), int(image_size[1])
    height = width = V_IMAGE_SIZE // V_PATCH
    base = patch_embeddings[0]                                   # (height*width, TH)
    assert height * width == base.shape[0]
    newline = image_newline.astype(patch_embeddings.dtype)
    if patch_embeddings.shape[0] > 1:
        other = patch_embeddings[1:]
        npw, nph = get_anyres_image_grid_shape((orig_w, orig_h),
                                               IMAGE_GRID_PINPOINTS, V_IMAGE_SIZE)
        other = other.reshape(npw, nph, height, width, -1)
        other = jnp.transpose(other, (4, 0, 2, 1, 3)).reshape(-1, npw * height, nph * width)
        other = unpad_image(other, (orig_w, orig_h))
        hid, Hc, Wc = other.shape
        nl = jnp.broadcast_to(newline[:, None, None], (hid, Hc, 1))
        other = jnp.concatenate([other, nl], axis=-1)
        other = other.reshape(hid, -1).T
        return jnp.concatenate([base, other], axis=0)
    else:
        return jnp.concatenate([base, newline[None]], axis=0)


def merge_vision_embeddings(input_ids, inputs_embeds, vision_embeddings, image_token_id):
    mask = input_ids == image_token_id
    flat = vision_embeddings.reshape(-1, vision_embeddings.shape[-1])
    idx = jnp.clip(jnp.cumsum(mask.astype(jnp.int32)) - 1, 0, flat.shape[0] - 1)
    return jnp.where(mask[:, None], flat[idx], inputs_embeds)


# ----------------------------- language model -----------------------------
def rope_tables(positions, head_dim, theta=ROPE_THETA):
    # Hoisted once per forward, shared by all layers; consumed inside the attention kernel.
    half = head_dim // 2
    inv_freq = 1.0 / (theta ** (jnp.arange(half, dtype=jnp.float32) / half))
    freqs = positions.astype(jnp.float32)[:, None] * inv_freq[None, :]
    return jnp.cos(freqs), jnp.sin(freqs)                        # each (T, half) f32


def llama_decoder_layer(p, x, rope_cos, rope_sin):
    # TODO(synk): paged KV cache / AttentionMetadata not modeled; full causal attention instead.
    T, D = x.shape
    qkv = fused_matmul(x, p["qkv_w"], norm="rms", gamma=p["in_ln"], eps=RMS_EPS)
    o = pallas_attention(qkv.reshape(1, T, 3 * D), heads=T_HEADS, head_dim=T_HEAD_DIM,
                         scale=T_HEAD_DIM ** -0.5, causal=True,
                         rope_cos=rope_cos, rope_sin=rope_sin)
    x = fused_matmul(o.reshape(T, D), p["o_w"], residual=x)          # o_proj + residual fused
    g = fused_rms_swiglu(x, p["post_ln"], p["gate_w"], p["up_w"])
    x = fused_matmul(g, p["down_w"], residual=x)                     # down_proj + residual fused
    return x


# ----------------------------- full LLaVA-NeXT forward -----------------------------
def llava_next_forward(params, input_ids, positions, pixel_values, image_sizes):
    # _process_image_pixels
    B, NP, C, H, W = pixel_values.shape
    stacked = pixel_values.reshape(B * NP, C, H, W)
    feats = clip_vision_tower(params, stacked)                   # (B*NP, S, VH) bf16
    if VISION_FEATURE_SELECT == "default":
        feats = feats[:, 1:]                                     # drop CLS

    # multi_modal_projector: linear -> gelu -> linear (two tiled fused matmuls)
    BN, S, _ = feats.shape
    h = fused_matmul(feats.reshape(BN * S, VH), params["proj1_w"],
                     bias=params["proj1_b"], act="gelu")
    h = fused_matmul(h, params["proj2_w"], bias=params["proj2_b"])
    patch_embeds = h.reshape(B, NP, S, TH)

    # spatial_unpad merge per image, then stack
    merged = [merge_image_patch_embeddings(image_sizes[i], patch_embeds[i],
                                           params["image_newline"]) for i in range(B)]
    vision_embeddings = jnp.stack(merged, axis=0)                # (B, n_img_tokens, TH)

    # language model
    inputs_embeds = jnp.take(params["embed_tokens"], input_ids, axis=0)
    inputs_embeds = merge_vision_embeddings(input_ids, inputs_embeds,
                                            vision_embeddings, IMAGE_TOKEN_ID)
    x = inputs_embeds
    rope_cos, rope_sin = rope_tables(positions, T_HEAD_DIM)      # hoisted once per forward
    for layer in params["t_layers"]:
        x = llama_decoder_layer(layer, x, rope_cos, rope_sin)
    hidden_states = pallas_rmsnorm(x, params["final_norm"])
    return hidden_states


def compute_logits(params, hidden_states):
    # logits_processor with logit_scale=1.0: hidden @ lm_head.weight^T (tiled, f32 logits)
    return fused_matmul(hidden_states, params["lm_head"], out_dtype=jnp.float32)


# ----------------------------- main -----------------------------
if __name__ == "__main__":
    key = jax.random.PRNGKey(0)
    pkey, xkey = jax.random.split(key)
    params = init_params(pkey)

    # one image, anyres grid 2x2 -> pixel_values (1, 1+4, 3, 16, 16)
    pixel_values = jax.random.normal(xkey, (1, 5, 3, V_IMAGE_SIZE, V_IMAGE_SIZE),
                                     dtype=jnp.float32)
    image_sizes = jnp.array([[32, 32]], dtype=jnp.int32)         # (width, height)

    # merged image feature length: base 2*2 + unpadded 2*2 rows * (2*2 + newline) = 24
    n_img_tokens = 24
    text_prefix = jnp.array([1, 5, 9, 13], dtype=jnp.int32)
    text_suffix = jnp.array([17, 21, 25, 29], dtype=jnp.int32)
    image_toks = jnp.full((n_img_tokens,), IMAGE_TOKEN_ID, dtype=jnp.int32)
    input_ids = jnp.concatenate([text_prefix, image_toks, text_suffix])   # (32,)
    positions = jnp.arange(input_ids.shape[0], dtype=jnp.int32)

    hidden_states = llava_next_forward(params, input_ids, positions,
                                       pixel_values, image_sizes)
    logits = compute_logits(params, hidden_states)
    jax.block_until_ready(hidden_states)
    jax.block_until_ready(logits)
    assert hidden_states.shape == (input_ids.shape[0], TH)
    assert logits.shape == (input_ids.shape[0], VOCAB)
    print("KERNEL_OK")
</pallas_src>

<mosaic_0001>
module attributes {stable_mosaic.version = 11 : i64} {
  func.func @_fused_matmul_kernel(%arg0: i32, %arg1: i32, %arg2: i32, %arg3: memref<20x192xbf16, #tpu.memory_space<vmem>>, %arg4: memref<192x32xbf16, #tpu.memory_space<vmem>>, %arg5: memref<20x32xf32, #tpu.memory_space<vmem>>, %arg6: memref<20x32xbf16, #tpu.memory_space<vmem>>, %arg7: memref<20x32xf32, #tpu.memory_space<vmem>>) attributes {dimension_semantics = [#tpu.dimension_semantics<parallel>, #tpu.dimension_semantics<parallel>, #tpu.dimension_semantics<arbitrary>], iteration_bounds = array<i64: 1, 1, 1>, scalar_prefetch = 0 : i64, scratch_operands = 1 : i64, tpu.core_type = #tpu.core_type<tc>, window_params = [{transform_indices = @transform_0, window_bounds = array<i64: 20, 192>}, {transform_indices = @transform_1, window_bounds = array<i64: 192, 32>}, {transform_indices = @transform_2, window_bounds = array<i64: 20, 32>}, {transform_indices = @transform_3, window_bounds = array<i64: 20, 32>}]} {
    %c0_i32 = arith.constant 0 : i32
    %0 = arith.cmpi eq, %arg2, %c0_i32 : i32
    %1 = arith.extui %0 : i1 to i32
    %c0_i32_0 = arith.constant 0 : i32
    %2 = arith.cmpi ne, %1, %c0_i32_0 : i32
    scf.if %2 {
      %cst_10 = arith.constant 0.000000e+00 : f32
      %12 = vector.broadcast %cst_10 : f32 to vector<20x32xf32>
      %c0_11 = arith.constant 0 : index
      %c0_12 = arith.constant 0 : index
      %13 = vector.load %arg7[%c0_11, %c0_12] : memref<20x32xf32, #tpu.memory_space<vmem>>, vector<20x32xf32>
      tpu.vector_store %arg7[%c0_11, %c0_12], %12 {strides = array<i32>} : memref<20x32xf32, #tpu.memory_space<vmem>>, vector<20x32xf32>,
    } else {
    }
    %c0 = arith.constant 0 : index
    %c0_1 = arith.constant 0 : index
    %3 = vector.load %arg3[%c0, %c0_1] : memref<20x192xbf16, #tpu.memory_space<vmem>>, vector<20x192xbf16>
    %c0_2 = arith.constant 0 : index
    %c0_3 = arith.constant 0 : index
    %4 = vector.load %arg7[%c0_2, %c0_3] : memref<20x32xf32, #tpu.memory_space<vmem>>, vector<20x32xf32>
    %c0_4 = arith.constant 0 : index
    %c0_5 = arith.constant 0 : index
    %5 = vector.load %arg4[%c0_4, %c0_5] : memref<192x32xbf16, #tpu.memory_space<vmem>>, vector<192x32xbf16>
    %cst = arith.constant dense<0.000000e+00> : vector<20x32xf32>
    %6 = tpu.matmul %3, %5, %cst {dimension_numbers = #tpu.dot_dimension_numbers<[1], [0], [0], [1], [0, 0, 1, 1], [], []>} : vector<20x192xbf16>, vector<192x32xbf16>, vector<20x32xf32> -> vector<20x32xf32>
    %7 = arith.addf %4, %6 : vector<20x32xf32>
    %c0_6 = arith.constant 0 : index
    %c0_7 = arith.constant 0 : index
    %8 = vector.load %arg7[%c0_6, %c0_7] : memref<20x32xf32, #tpu.memory_space<vmem>>, vector<20x32xf32>
    tpu.vector_store %arg7[%c0_6, %c0_7], %7 {strides = array<i32>} : memref<20x32xf32, #tpu.memory_space<vmem>>, vector<20x32xf32>,
    %c0_i32_8 = arith.constant 0 : i32
    %9 = arith.cmpi eq, %arg2, %c0_i32_8 : i32
    %10 = arith.extui %9 : i1 to i32
    %c0_i32_9 = arith.constant 0 : i32
    %11 = arith.cmpi ne, %10, %c0_i32_9 : i32
    scf.if %11 {
      %c0_10 = arith.constant 0 : index
      %c0_11 = arith.constant 0 : index
      %12 = vector.load %arg7[%c0_10, %c0_11] : memref<20x32xf32, #tpu.memory_space<vmem>>, vector<20x32xf32>
      %c0_12 = arith.constant 0 : index
      %c0_13 = arith.constant 0 : index
      %13 = vector.load %arg5[%c0_12, %c0_13] : memref<20x32xf32, #tpu.memory_space<vmem>>, vector<20x32xf32>
      %14 = arith.addf %12, %13 : vector<20x32xf32>
      %15 = arith.truncf %14 : vector<20x32xf32> to vector<20x32xbf16>
      %c0_14 = arith.constant 0 : index
      %c0_15 = arith.constant 0 : index
      %16 = vector.load %arg6[%c0_14, %c0_15] : memref<20x32xbf16, #tpu.memory_space<vmem>>, vector<20x32xbf16>
      tpu.vector_store %arg6[%c0_14, %c0_15], %15 {strides = array<i32>} : memref<20x32xbf16, #tpu.memory_space<vmem>>, vector<20x32xbf16>,
    } else {
    }
    return
  }
  func.func @transform_0(%arg0: i32, %arg1: i32, %arg2: i32) -> (i32, i32) {
    %c0_i32 = arith.constant 0 : i32
    return %arg0, %arg2 : i32, i32
  }
  func.func @transform_1(%arg0: i32, %arg1: i32, %arg2: i32) -> (i32, i32) {
    %c0_i32 = arith.constant 0 : i32
    return %arg2, %arg1 : i32, i32
  }
  func.func @transform_2(%arg0: i32, %arg1: i32, %arg2: i32) -> (i32, i32) {
    %c0_i32 = arith.constant 0 : i32
    return %arg0, %arg1 : i32, i32
  }
  func.func @transform_3(%arg0: i32, %arg1: i32, %arg2: i32) -> (i32, i32) {
    %c0_i32 = arith.constant 0 : i32
    return %arg0, %arg1 : i32, i32
  }
}

</mosaic_0001>

<bundles_post_ra>
// kernel: tpu_custom_call.1
= control target key start
LH: loop header
LB: loop body
LE: loop exit
PB: predicated region body
PF: predicated region fallthrough
CT: control target
= control target key end

     0   :  { %s437_s0 = inlined_call_operand.vmem [shape: bf16[20,192], index: 0, kind: input, shape index: {}]   ;;  %s438_s1 = inlined_call_operand.vmem [shape: bf16[192,32], index: 1, kind: input, shape index: {}]   ;;  %s439_s2 = inlined_call_operand.vmem [shape: f32[20,32], index: 2, kind: input, shape index: {}]   ;;  %s440_s3 = inlined_call_operand.hbm [shape: bf16[20,32], index: 3, kind: output, shape index: {}]  }
   0x1   :  { %v297_v0 = vld [vmem:[%s438_s1 + $0x38] sm:$0xff]  ;;  %v296_v2 = vld [vmem:[%s438_s1 + $0x30] sm:$0xff] }
   0x2   :  { %v301_v1 = vld [vmem:[%s438_s1 + $0x58] sm:$0xff]  ;;  %149 = vmatpush.bf16.msra.mxu0 %v297_v0  ;;  %302 = vmatpush.bf16.msra.mxu2 %v297_v0  ;;  %v300_v3 = vld [vmem:[%s438_s1 + $0x50] sm:$0xff] }
   0x3   :  { %171 = vmatpush.bf16.msra.mxu1 %v301_v1 }
   0x4   :  { %8 = vsyncpa [#allocation4], 0  ;;  %v295_v4 = vld [vmem:[%s438_s1 + $0x28] sm:$0xff]  ;;  %v294_v6 = vld [vmem:[%s438_s1 + $0x20] sm:$0xff]  ;;  %vm142_vm0 = vcmask 523264   ;;  %vm20_vm1 = vcmask 261120  }
   0x5   :  { %v299_v5 = vld [vmem:[%s438_s1 + $0x48] sm:$0xff]  ;;  %v298_v7 = vld [vmem:[%s438_s1 + $0x40] sm:$0xff]  ;;  %v293_v11 = vld [vmem:[%s438_s1 + $0x18] sm:$0xff]  ;;  %v340_v23 = vmov 0.0   ;;  %vm23_vm2 = vcmask 257024   ;;  %s341_s23 = smov [#allocation3]  }
   0x6   :  { %150 = vmatpush.bf16.msra.mxu0 %v296_v2  ;;  %303 = vmatpush.bf16.msra.mxu2 %v296_v2  ;;  %v288_v8 = vld [vmem:[%s437_s0 + $0x4] sm:$0xf]  ;;  %v234_v9 = vld [vmem:[%s437_s0 + $0x8] sm:$0xf0]  ;;  %v292_v12 = vld [vmem:[%s438_s1 + $0x10] sm:$0xff]  ;;  %21 = vst.msk [vmem:[#allocation2] sm:$0xff] %vm20_vm1, %v340_v23 }
   0x7   :  { %172 = vmatpush.bf16.msra.mxu1 %v300_v3  ;;  %v237_v10 = vor.u32 %v288_v8, %v234_v9  ;;  %v291_v13 = vld [vmem:[%s438_s1 + $0x8] sm:$0xff]  ;;  %v27_v14 = vld [vmem:[%s437_s0 + $0x10] sm:$0x33]  ;;  %v290_v15 = vld [vmem:[%s438_s1] sm:$0xff]  ;;  %22 = vst.msk [vmem:[#allocation2 + $0x8] sm:$0xff] %vm20_vm1, %v340_v23  ;;  %s216_s24 = sshll.u32 %s341_s23, 4  ;;  %s217_s24 = int_to_ptr.vmem [resolvable:$true] %s216_s24 }
   0x8   :  { %v232_v16 = vld [vmem:[%s437_s0] sm:$0xf]  ;;  %v289_v17 = vld [vmem:[%s437_s0 + $0x4] sm:$0xf0]  ;;  %v62_v18 = vunpack.c.l.b16 %v27_v14  ;;  %v63_v19 = vunpack.c.h.b16 %v27_v14  ;;  %24 = vst.msk [vmem:[#allocation2 + $0x10] sm:$0xf] %vm23_vm2, %v340_v23 }
   0x9   :  { %v233_v20 = vor.u32 %v289_v17, %v232_v16  ;;  %v199_v39 = vld [vmem:[%s439_s2] sm:$0xff]  ;;  %v201_v45 = vld [vmem:[%s439_s2 + $0x10] sm:$0xf]  ;;  %v200_v46 = vld [vmem:[%s439_s2 + $0x8] sm:$0xff]  ;;  %s218_s27 = sshll.u32 %s440_s3, 4  ;;  %vm210_vm3 = vcmask 254976   ;;  %s219_s27 = int_to_ptr.hbm [resolvable:$true] %s218_s27 }
   0xa   :  { %151 = vmatpush.bf16.msra.mxu0 %v295_v4  ;;  %304 = vmatpush.bf16.msra.mxu2 %v295_v4  ;;  %v66_v21 = vpack.c.b16 %v62_v18, %v62_v18  ;;  %v67_v22 = vpack.c.b16 %v63_v19, %v63_v19  ;;  %s342_s28 = smov 64   ;;  %s343_s2 = smov 4  }
   0xb   :  { %173 = vmatpush.bf16.msra.mxu1 %v299_v5 }
   0xd   :  { %v28_v26 = vld [vmem:[#allocation2] sm:$0xff] }
   0xe   :  { %152 = vmatpush.bf16.msra.mxu0 %v294_v6  ;;  %305 = vmatpush.bf16.msra.mxu2 %v294_v6  ;;  %v29_v34 = vld [vmem:[#allocation2 + $0x8] sm:$0xff] }
   0xf   :  { %174 = vmatpush.bf16.msra.mxu1 %v298_v7  ;;  %v30_v31 = vld [vmem:[#allocation2 + $0x10] sm:$0xf] }
  0x12   :  { %286 = vmatmul.msk.bf16.vlgmr.msra.gmra.mxu1 %vm142_vm0, %v237_v10  ;;  %153 = vmatpush.bf16.msra.mxu0 %v293_v11 }
  0x13   :  { %306 = vmatpush.bf16.msra.mxu2 %v293_v11 }
  0x16   :  { %154 = vmatpush.bf16.msra.mxu0 %v292_v12 }
  0x17   :  { %307 = vmatpush.bf16.msra.mxu2 %v292_v12 }
  0x1a   :  { %155 = vmatpush.bf16.msra.mxu0 %v291_v13 }
  0x1b   :  { %308 = vmatpush.bf16.msra.mxu2 %v291_v13 }
  0x1e   :  { %156 = vmatpush.bf16.msra.mxu0 %v290_v15 }
  0x1f   :  { %309 = vmatpush.bf16.msra.mxu2 %v290_v15 }
  0x21   :  { %157 = vmatmul.bf16.vlgmr.msra.gmra.mxu0 %v233_v20 }
  0x22   :  { %162 = vmatmul.bf16.vlgmr.msra.gmra.mxu2 %v66_v21  ;;  %287 = vmatmul.msk.bf16.gmra.mxu1 %vm142_vm0, %v67_v22 }
  0x8f   :  { %v176_v24 = vpop.f32.mrf.mxu1 }
  0x97   :  { %v178_v25 = vpop.f32.mrf.mxu1 }
  0x9e   :  { %v158_v27 = vpop.f32.mrf.mxu0 }
  0x9f   :  { %v177_v28 = vadd.f32 %v176_v24, %v158_v27  ;;  %v181_v29 = vpop.f32.mrf.mxu1 }
  0xa1   :  { %v185_v30 = vadd.f32 %v177_v28, %v28_v26 }
  0xa3   :  { %189 = vst.msk [vmem:[#allocation2] sm:$0xff] %vm20_vm1, %v185_v30 }
  0xa5   :  { %v163_v32 = vpop.f32.mrf.mxu2 }
  0xa6   :  { %v182_v33 = vadd.f32 %v181_v29, %v163_v32  ;;  %v160_v35 = vpop.f32.mrf.mxu0 }
  0xa7   :  { %v179_v36 = vadd.f32 %v178_v25, %v160_v35  ;;  %v183_v37 = vpop.f32.mrf.mxu1 }
  0xa8   :  { %v187_v38 = vadd.f32 %v182_v33, %v30_v31 }
  0xa9   :  { %v186_v40 = vadd.f32 %v179_v36, %v29_v34 }
  0xaa   :  { %192 = vst.msk [vmem:[#allocation2 + $0x10] sm:$0xf] %vm23_vm2, %v187_v38  ;;  %v196_v41 = vld [vmem:[#allocation2] sm:$0xff] }
  0xab   :  { %190 = vst.msk [vmem:[#allocation2 + $0x8] sm:$0xff] %vm20_vm1, %v186_v40  ;;  %v202_v42 = vadd.f32 %v199_v39, %v196_v41 }
  0xad   :  { %v165_v43 = vpop.f32.mrf.mxu2  ;;  %v205_v44 = vpack.c.bf16 %v202_v42, %v202_v42 }
  0xaf   :  { %208 = vst.msk [vmem:[#allocation3] sm:$0xf] %vm23_vm2, %v205_v44 }
  0xb1   :  { %v198_v47 = vld [vmem:[#allocation2 + $0x10] sm:$0xf] }
  0xb2   :  { %v197_v48 = vld [vmem:[#allocation2 + $0x8] sm:$0xff]  ;;  %v204_v49 = vadd.f32 %v201_v45, %v198_v47 }
  0xb3   :  { %v203_v50 = vadd.f32 %v200_v46, %v197_v48 }
  0xb4   :  { %v207_v51 = vpack.c.bf16 %v204_v49, %v204_v49 }
  0xb5   :  { %v206_v52 = vpack.c.bf16 %v203_v50, %v203_v50 }
  0xb6   :  { %211 = vst.msk [vmem:[#allocation3 + $0x8] sm:$0x3] %vm210_vm3, %v207_v51 }
  0xb7   :  { %209 = vst.msk [vmem:[#allocation3 + $0x4] sm:$0xf] %vm23_vm2, %v206_v52 }
  0xb8   :  { %224 = dma.vmem_to_hbm [thread:$0]  %s217_s24, 192, %s219_s27, [#allocation4], %s342_s28, %s342_s28, %s343_s2  }
  0xb9   :  { %338 = dma.done.wait [#allocation4], 192  }
  0xba   :  { %339 = vsyncadd [#allocation4], 4294967104 }
  0xbb   :  { %229 = vsyncpa [#allocation4], 1 }

</bundles_post_ra>
